<compile_context>
chip_gen: v7x
topology: tpu7x:2x2x1
jax: 0.10.0
libtpu: 0.0.40
codegen_flags: <defaults>
</compile_context>

<pallas_src>
import functools

import jax
import jax.numpy as jnp
from jax.experimental import pallas as pl
from jax.experimental.pallas import tpu as pltpu


def _round_down(x, m):
    return (x // m) * m


def _round_up(x, m):
    return ((x + m - 1) // m) * m


def _vmem_budget():
    """(scoped vmem_limit_bytes, per-buffer tile budget) from the chip's VMEM."""
    cap = 64 * 1024 * 1024            # conservative default = v7x physical VMEM
    try:
        info = pltpu.get_tpu_info()
        cap = int(getattr(info, "vmem_capacity_bytes", cap) or cap)
    except Exception:
        pass
    limit = min((cap * 3) // 4, 96 * 1024 * 1024)          # headroom below physical
    per_buf = max(2 * 1024 * 1024, min(limit // 6, 12 * 1024 * 1024))
    return limit, per_buf


def _pick_lane_tile(hw, max_lanes):
    """Largest multiple-of-128 lane tile <= hw (full hw when hw < 128)."""
    if hw >= 128:
        return max(128, min(max_lanes, _round_down(hw, 128)))
    return hw


def _pick_row_tile(rows, max_rows):
    """Multiple-of-8 row tile <= rows (full rows when rows < 8)."""
    if rows < 8:
        return rows
    max_rows = max(8, _round_down(max_rows, 8))
    return max(8, min(_round_down(rows, 8), max_rows))


# --------------------------- Pass 1: pooling --------------------------------

def _pool_kernel(x_ref, psum_ref, acc_ref, *, hw, hw_tile, n_slices, slice_w,
                 need_mask):
    # x_ref:    (row_tile, hw_tile)  input dtype (f32 / bf16)
    # psum_ref: (row_tile, 1) f32 per-row sums (resident across the hw axis)
    # acc_ref:  (row_tile, slice_w) f32 VPU accumulator scratch
    j = pl.program_id(1)

    @pl.when(j == 0)
    def _init():
        acc_ref[...] = jnp.zeros_like(acc_ref)

    if need_mask:
        start = j * hw_tile
        lane = jax.lax.broadcasted_iota(jnp.int32, acc_ref.shape, 1)

    # VPU accumulation over 128-lane slices (no per-step XLU reduce / relayout).
    for k in range(n_slices):
        sl = x_ref[:, k * slice_w:(k + 1) * slice_w].astype(jnp.float32)
        if need_mask:
            sl = jnp.where((start + k * slice_w + lane) < hw, sl, 0.0)
        acc_ref[...] += sl

    @pl.when(j == pl.num_programs(1) - 1)
    def _finalize():
        # Single cross-lane reduce per row block.
        psum_ref[...] = jnp.sum(acc_ref[...], axis=-1, keepdims=True)


def _pool_sums(x2, rows, hw, row_tile, hw_tile, slice_w, vmem_limit):
    n_row = pl.cdiv(rows, row_tile)
    n_hw = pl.cdiv(hw, hw_tile)
    kern = functools.partial(
        _pool_kernel, hw=hw, hw_tile=hw_tile,
        n_slices=hw_tile // slice_w, slice_w=slice_w,
        need_mask=(hw % hw_tile != 0))
    return pl.pallas_call(
        kern,
        out_shape=jax.ShapeDtypeStruct((rows, 1), jnp.float32),
        grid_spec=pltpu.PrefetchScalarGridSpec(
            num_scalar_prefetch=0,
            grid=(n_row, n_hw),
            in_specs=[pl.BlockSpec((row_tile, hw_tile), lambda r, j: (r, j))],
            out_specs=pl.BlockSpec((row_tile, 1), lambda r, j: (r, 0)),
            scratch_shapes=[pltpu.VMEM((row_tile, slice_w), jnp.float32)],
        ),
        compiler_params=pltpu.CompilerParams(
            dimension_semantics=("parallel", "arbitrary"),
            vmem_limit_bytes=vmem_limit,
        ),
        cost_estimate=pl.CostEstimate(
            flops=rows * hw,
            transcendentals=0,
            bytes_accessed=rows * hw * x2.dtype.itemsize + rows * 4,
        ),
    )(x2)


# ------------------- Tiny MLP + BatchNorm1d (single block) ------------------

def _mlp_bn_kernel(y_ref, w1t_ref, b1_ref, w2t_ref, b2_ref, gate_ref, *,
                   inv_hw, inv_b):
    y = y_ref[...] * inv_hw                                   # pooled mean (b, c)
    h = jnp.dot(y, w1t_ref[...], preferred_element_type=jnp.float32) + b1_ref[...]
    h = jnp.maximum(h, 0.0)
    z = jnp.dot(h, w2t_ref[...], preferred_element_type=jnp.float32) + b2_ref[...]
    # BatchNorm1d, training-mode batch statistics (biased variance),
    # gamma=1, beta=0, eps=1e-5.
    mu = jnp.sum(z, axis=0, keepdims=True) * inv_b
    d = z - mu
    var = jnp.sum(d * d, axis=0, keepdims=True) * inv_b
    gate_ref[...] = d * jax.lax.rsqrt(var + 1e-5)


# ------------------------ Pass 2: broadcast / expand ------------------------

def _broadcast_kernel(gate_ref, out_ref):
    # gate_ref: (row_tile, 1) f32; out_ref: (row_tile, hw_tile) lane-dense.
    g = gate_ref[...].astype(out_ref.dtype)
    out_ref[...] = jnp.broadcast_to(g, out_ref.shape)


# --------------------------------- Wrapper ----------------------------------

def channel_gate(x, w1, b1, w2, b2):
    """x: (b, c, h, w). w1: (hidden, c), b1: (hidden,), w2: (c, hidden), b2: (c,)."""
    b, c, h, w = x.shape
    hw = h * w
    rows = b * c
    hidden = w1.shape[0]
    f32 = jnp.float32
    itemsize = x.dtype.itemsize

    vmem_limit, per_buf = _vmem_budget()
    ws_budget = (vmem_limit * 3) // 4
    max_lanes = 2048 if itemsize <= 2 else 1024

    x2 = x.reshape(rows, hw)      # contiguous view, no copy

    # ---------------- Pass 1: pooled sums (rows, 1) ----------------
    hw_tile = _pick_lane_tile(hw, max_lanes)
    slice_w = 128 if hw_tile % 128 == 0 else hw_tile
    bytes_per_row1 = 2 * hw_tile * itemsize + slice_w * 4 + 2 * 512
    row_tile = _pick_row_tile(
        rows, min(per_buf // (hw_tile * itemsize), ws_budget // bytes_per_row1))
    # Force >=2 row blocks when possible so the streaming reduction shards
    # across both TensorCores on v7x.
    if pl.cdiv(rows, row_tile) == 1 and rows >= 16:
        row_tile = max(8, _round_up(pl.cdiv(rows, 2), 8))
    psum = _pool_sums(x2, rows, hw, row_tile, hw_tile, slice_w, vmem_limit)

    # ---------------- MLP + BN: tiny, off the roofline ----------------
    gate = pl.pallas_call(
        functools.partial(_mlp_bn_kernel, inv_hw=1.0 / hw, inv_b=1.0 / b),
        out_shape=jax.ShapeDtypeStruct((b, c), f32),
        cost_estimate=pl.CostEstimate(
            flops=4 * b * c * hidden + 8 * b * c,
            transcendentals=0,
            bytes_accessed=(2 * b * c + 2 * c * hidden + hidden + c) * 4),
    )(
        psum.reshape(b, c),
        w1.T.astype(f32),                   # (c, hidden)
        b1.reshape(1, hidden).astype(f32),
        w2.T.astype(f32),                   # (hidden, c)
        b2.reshape(1, c).astype(f32),
    )

    # ---------------- Pass 2: expand gate to (b, c, h, w) ----------------
    gate_rows = gate.reshape(rows, 1)
    hw_tile2 = _pick_lane_tile(hw, max_lanes)
    bytes_per_row2 = 2 * hw_tile2 * itemsize + 2 * 512
    row_tile2 = _pick_row_tile(
        rows, min(per_buf // (hw_tile2 * itemsize), ws_budget // bytes_per_row2))
    if (pl.cdiv(rows, row_tile2) == 1 and pl.cdiv(hw, hw_tile2) == 1
            and rows >= 16):
        row_tile2 = max(8, _round_up(pl.cdiv(rows, 2), 8))
    n_row2 = pl.cdiv(rows, row_tile2)
    n_hw2 = pl.cdiv(hw, hw_tile2)

    out_flat = pl.pallas_call(
        _broadcast_kernel,
        out_shape=jax.ShapeDtypeStruct((rows, hw), x.dtype),
        grid_spec=pltpu.PrefetchScalarGridSpec(
            num_scalar_prefetch=0,
            grid=(n_row2, n_hw2),
            in_specs=[pl.BlockSpec((row_tile2, 1), lambda r, j: (r, 0))],
            out_specs=pl.BlockSpec((row_tile2, hw_tile2), lambda r, j: (r, j)),
        ),
        compiler_params=pltpu.CompilerParams(
            dimension_semantics=("parallel", "parallel"),
            vmem_limit_bytes=vmem_limit,
        ),
        cost_estimate=pl.CostEstimate(
            flops=0, transcendentals=0,
            bytes_accessed=rows * hw * itemsize + rows * 4),
    )(gate_rows)

    return out_flat.reshape(b, c, h, w)


def channel_gate_ref(x, w1, b1, w2, b2):
    """Pure-JAX reference of the PyTorch forward (training-mode BN)."""
    b, c, h, w = x.shape
    y = jnp.mean(x.astype(jnp.float32), axis=(2, 3))               # (b, c)
    y = jnp.maximum(y @ w1.T + b1, 0.0)
    y = y @ w2.T + b2
    mu = jnp.mean(y, axis=0, keepdims=True)
    var = jnp.mean((y - mu) ** 2, axis=0, keepdims=True)
    y = (y - mu) / jnp.sqrt(var + 1e-5)
    return jnp.broadcast_to(y[:, :, None, None], (b, c, h, w)).astype(x.dtype)


if __name__ == "__main__":
    # channel=32, reduction=16 -> hidden=2; batch=4, spatial 14x14 (hw=196,
    # NOT a multiple of 128 -> exercises the masked-tail / cdiv-grid path).
    B, C, H, W = 4, 32, 14, 14
    R = 16
    HID = C // R

    key = jax.random.PRNGKey(0)
    kx, k1, k2, k3, k4 = jax.random.split(key, 5)
    x = jax.random.normal(kx, (B, C, H, W), dtype=jnp.float32)

    w1 = jax.random.uniform(k1, (HID, C), jnp.float32, -0.1, 0.1)
    b1 = jax.random.uniform(k2, (HID,), jnp.float32, -0.1, 0.1)
    w2 = jax.random.uniform(k3, (C, HID), jnp.float32, -0.1, 0.1)
    b2 = jax.random.uniform(k4, (C,), jnp.float32, -0.1, 0.1)

    out = jax.block_until_ready(channel_gate(x, w1, b1, w2, b2))

    ref = channel_gate_ref(x, w1, b1, w2, b2)
    assert out.shape == (B, C, H, W)
    assert jnp.allclose(out, ref, atol=1e-4, rtol=1e-4), "mismatch vs reference"

    print("KERNEL_OK")
</pallas_src>

<mosaic_0001>
module attributes {stable_mosaic.version = 11 : i64} {
  func.func @_pool_kernel(%arg0: i32, %arg1: i32, %arg2: memref<64x128xf32, #tpu.memory_space<vmem>>, %arg3: memref<64x1xf32, #tpu.memory_space<vmem>>, %arg4: memref<64x128xf32, #tpu.memory_space<vmem>>) attributes {dimension_semantics = [#tpu.dimension_semantics<parallel>, #tpu.dimension_semantics<arbitrary>], iteration_bounds = array<i64: 2, 2>, scalar_prefetch = 0 : i64, scratch_operands = 1 : i64, tpu.core_type = #tpu.core_type<tc>, window_params = [{transform_indices = @transform_0, window_bounds = array<i64: 64, 128>}, {transform_indices = @transform_1, window_bounds = array<i64: 64, 1>}]} {
    %c0_i32 = arith.constant 0 : i32
    %0 = arith.cmpi eq, %arg1, %c0_i32 : i32
    %1 = arith.extui %0 : i1 to i32
    %c0_i32_0 = arith.constant 0 : i32
    %2 = arith.cmpi ne, %1, %c0_i32_0 : i32
    scf.if %2 {
      %cst_8 = arith.constant 0.000000e+00 : f32
      %19 = vector.broadcast %cst_8 : f32 to vector<64x128xf32>
      %c0_9 = arith.constant 0 : index
      %c0_10 = arith.constant 0 : index
      %20 = vector.load %arg4[%c0_9, %c0_10] : memref<64x128xf32, #tpu.memory_space<vmem>>, vector<64x128xf32>
      tpu.vector_store %arg4[%c0_9, %c0_10], %19 {strides = array<i32>} : memref<64x128xf32, #tpu.memory_space<vmem>>, vector<64x128xf32>,
    } else {
    }
    %c128_i32 = arith.constant 128 : i32
    %3 = arith.muli %arg1, %c128_i32 : i32
    %4 = tpu.iota {dimensions = array<i32: 1>} : vector<64x128xi32>
    %c0 = arith.constant 0 : index
    %c0_1 = arith.constant 0 : index
    %5 = vector.load %arg2[%c0, %c0_1] : memref<64x128xf32, #tpu.memory_space<vmem>>, vector<64x128xf32>
    %c0_i32_2 = arith.constant 0 : i32
    %6 = arith.addi %3, %c0_i32_2 : i32
    %7 = vector.broadcast %6 : i32 to vector<64x128xi32>
    %8 = arith.addi %7, %4 : vector<64x128xi32>
    %c196_i32 = arith.constant 196 : i32
    %9 = vector.broadcast %c196_i32 : i32 to vector<64x128xi32>
    %10 = arith.cmpi slt, %8, %9 : vector<64x128xi32>
    %cst = arith.constant 0.000000e+00 : f32
    %11 = vector.broadcast %cst : f32 to vector<64x128xf32>
    %12 = arith.select %10, %5, %11 : vector<64x128xi1>, vector<64x128xf32>
    %c0_3 = arith.constant 0 : index
    %c0_4 = arith.constant 0 : index
    %13 = vector.load %arg4[%c0_3, %c0_4] : memref<64x128xf32, #tpu.memory_space<vmem>>, vector<64x128xf32>
    %14 = arith.addf %13, %12 : vector<64x128xf32>
    %c0_5 = arith.constant 0 : index
    %c0_6 = arith.constant 0 : index
    %15 = vector.load %arg4[%c0_5, %c0_6] : memref<64x128xf32, #tpu.memory_space<vmem>>, vector<64x128xf32>
    tpu.vector_store %arg4[%c0_5, %c0_6], %14 {strides = array<i32>} : memref<64x128xf32, #tpu.memory_space<vmem>>, vector<64x128xf32>,
    %c1_i32 = arith.constant 1 : i32
    %16 = arith.cmpi eq, %arg1, %c1_i32 : i32
    %17 = arith.extui %16 : i1 to i32
    %c0_i32_7 = arith.constant 0 : i32
    %18 = arith.cmpi ne, %17, %c0_i32_7 : i32
    scf.if %18 {
      %c0_8 = arith.constant 0 : index
      %c0_9 = arith.constant 0 : index
      %19 = vector.load %arg4[%c0_8, %c0_9] : memref<64x128xf32, #tpu.memory_space<vmem>>, vector<64x128xf32>
      %cst_10 = arith.constant dense<0.000000e+00> : vector<64xf32>
      %20 = vector.multi_reduction <add>, %19, %cst_10 [1] : vector<64x128xf32> to vector<64xf32>
      %21 = vector.shape_cast %20 : vector<64xf32> to vector<64x1xf32>
      %c0_11 = arith.constant 0 : index
      %c0_12 = arith.constant 0 : index
      %22 = vector.load %arg3[%c0_11, %c0_12] : memref<64x1xf32, #tpu.memory_space<vmem>>, vector<64x1xf32>
      tpu.vector_store %arg3[%c0_11, %c0_12], %21 {strides = array<i32>} : memref<64x1xf32, #tpu.memory_space<vmem>>, vector<64x1xf32>,
    } else {
    }
    return
  }
  func.func @transform_0(%arg0: i32, %arg1: i32) -> (i32, i32) {
    %c0_i32 = arith.constant 0 : i32
    return %arg0, %arg1 : i32, i32
  }
  func.func @transform_1(%arg0: i32, %arg1: i32) -> (i32, i32) {
    %c0_i32 = arith.constant 0 : i32
    %c0_i32_0 = arith.constant 0 : i32
    return %arg0, %c0_i32 : i32, i32
  }
}

</mosaic_0001>

<bundles_post_ra>
// kernel: tpu_custom_call.1
= control target key start
LH: loop header
LB: loop body
LE: loop exit
PB: predicated region body
PF: predicated region fallthrough
CT: control target
= control target key end

     0   :  { %s511_s6 = smov 0   ;;  %s513_s7 = smov 0   ;;  %s638_s0 = inlined_call_operand.vmem [shape: f32[128,196], index: 0, kind: input, shape index: {}]   ;;  %s639_s1 = inlined_call_operand.vmem [shape: f32[128,1], index: 1, kind: output, shape index: {}]  }
   0x1   :  { %s515_s8 = smov 0   ;;  %s517_s9 = smov 0  }
   0x2   :  { %s519_s10 = smov 0   ;;  %s521_s11 = smov 0  }
   0x3   :  { %s523_s12 = smov 0  }
   0x4 LB: > { %s20_s13 = sadd.s32 1, %s490_s10  ;;  %s23_s14 = sadd.s32 1, %s494_s11  ;;  %s498_s12 = sphi %s523_s12, %s11_s12   ;;  %s494_s11 = sphi %s521_s11, %s645_s11   ;;  %s490_s10 = sphi %s519_s10, %s644_s10   ;;  %s486_s9 = sphi %s517_s9, %s643_s9   ;;  %s482_s8 = sphi %s515_s8, %s642_s8   ;;  %s478_s7 = sphi %s513_s7, %s641_s7   ;;  %s474_s6 = sphi %s511_s6, %s640_s6  }
   0x5   : > { %p21_p0 = scmp.ge.s32.totalorder %s20_s13, 2  ;;  %p39_p1 = scmp.ne.s32.totalorder %s478_s7, %s474_s6 }
   0x6   : > { %p40_p2 = scmp.eq.s32.totalorder %s498_s12, 0  ;;  %s32_s18 = sadd.s32 1, %s478_s7 }
   0x7   : > { %s647_s13 = smov (%p21_p0, %s20_s13), 0  ;;  %s649_s14 = smov (!%p21_p0, %s23_s14), %s494_s11 }
   0x8   : > { %p41_p3 = por %p40_p2, %p39_p1  ;;  %p25_p4 = scmp.ge.s32.totalorder %s649_s14, 2 }
   0x9   : > { %s28_s15 = ssub.s32 %s490_s10, %s647_s13  ;;  %p372_p6 = scmp.ge.s32.totalorder %s498_s12, 4 }
   0xa   : > { %s651_s14 = smov (%p25_p4, %s649_s14), 0 }
   0xb   : > { %s27_s16 = ssub.s32 %s494_s11, %s651_s14  ;;  %91 = sbr.rel (%p372_p6) target bundleno = 28 (0x1c), region = 16 }
   0xc   : > { %s29_s17 = sor.u32 %s28_s15, %s27_s16 }
   0xd   : > { %p30_p5 = scmp.eq.s32.totalorder %s29_s17, 0 }
   0xf   : > { %s562_s19 = scalar_select %p30_p5, %s478_s7, %s32_s18  }
  0x12   : > { %94 = sbr.rel (!%p41_p3) target bundleno = 28 (0x1c), region = 20  ;;  %s96_s20 = sand.u32 (%p41_p3), 1, %s478_s7  }
  0x13   : > { %s386_s21 = sshll.u32 (%p41_p3), %s494_s11, 4  ;;  %s373_s22 = sshll.u32 (%p41_p3), %s96_s20, 6 }
  0x14   : > { %s101_s23 = sadd.s32 (%p41_p3), %s490_s10, %s386_s21  ;;  %s98_s28 = scalar_lea.vmem (%p41_p3), [#allocation3], %s373_s22 }
  0x15   : > { %s376_s24 = sshll.u32 (%p41_p3), %s101_s23, 3 }
  0x16   : > { %s103_s27 = scalar_lea.vmem (%p41_p3), %s638_s0, %s376_s24 }
  0x17   : > { %v145_v0 = vld [vmem:[%s103_s27] sm:$0xff] (%p41_p3)  ;;  %v147_v1 = vld [vmem:[%s103_s27 + $0x10] sm:$0xff] (%p41_p3) }
  0x18   : > { %v149_v2 = vld [vmem:[%s103_s27 + $0x20] sm:$0xff] (%p41_p3)  ;;  %146 = vst [vmem:[%s98_s28] sm:$0xff] (%p41_p3), %v145_v0  ;;  %148 = vst [vmem:[%s98_s28 + $0x8] sm:$0xff] (%p41_p3), %v147_v1  ;;  %v151_v3 = vld [vmem:[%s103_s27 + $0x30] sm:$0xff] (%p41_p3) }
  0x19   : > { %150 = vst [vmem:[%s98_s28 + $0x10] sm:$0xff] %v149_v2  ;;  %v153_v4 = vld [vmem:[%s103_s27 + $0x40] sm:$0xff]  ;;  %v155_v5 = vld [vmem:[%s103_s27 + $0x50] sm:$0xff]  ;;  %152 = vst [vmem:[%s98_s28 + $0x18] sm:$0xff] %v151_v3 }
  0x1a   : > { %154 = vst [vmem:[%s98_s28 + $0x20] sm:$0xff] %v153_v4  ;;  %156 = vst [vmem:[%s98_s28 + $0x28] sm:$0xff] %v155_v5  ;;  %v157_v6 = vld [vmem:[%s103_s27 + $0x60] sm:$0xff]  ;;  %v159_v7 = vld [vmem:[%s103_s27 + $0x70] sm:$0xff] }
  0x1b   : > { %158 = vst [vmem:[%s98_s28 + $0x30] sm:$0xff] %v157_v6  ;;  %160 = vst [vmem:[%s98_s28 + $0x38] sm:$0xff] %v159_v7 }
  0x1c PF: > { %p377_p7 = scmp.ge.s32.totalorder %s498_s12, 1  ;;  %p165_p8 = scmp.lt.s32.totalorder %s498_s12, 5 }
  0x1e   : > { %p166_p9 = pnand %p377_p7, %p165_p8 }
  0x1f   : > { %s172_s29 = sand.u32 (!%p166_p9), 1, %s474_s6   ;;  %s379_s30 = sshll.u32 (!%p166_p9), %s486_s9, 3 }
  0x20   : > { %169 = sbr.rel (%p166_p9) target bundleno = 220 (0xdc), region = 58  ;;  %s378_s2 = sshll.u32 (!%p166_p9), %s172_s29, 6 }
  0x21   : > { %p193_p10 = scmp.lt.s32.totalorder (!%p166_p9), %s379_s30, 15  ;;  %s580_s16 = scalar_lea.vmem (!%p166_p9), [#allocation3], %s378_s2 }
  0x22   : > { %p381_p11 = scmp.ne.s32.totalorder (!%p166_p9), %s482_s8, 0 }
  0x27   : > { %s653_s30 = smov (!%p193_p10, %s379_s30), 15  ;;  %201 = sbr.rel (%p381_p11) target bundleno = 46 (0x2e), region = 66 }
  0x28   : > { %s380_s3 = sshll.u32 %s653_s30, 3  ;;  %v500_v8 = vmov (!%p381_p11), 0.0  }
  0x29   : > { %s578_s15 = scalar_lea.vmem %s639_s1, %s380_s3  ;;  %202 = vst [vmem:[#allocation2] sm:$0xff] (!%p381_p11), %v500_v8  ;;  %203 = vst [vmem:[#allocation2 + $0x8] sm:$0xff] (!%p381_p11), %v500_v8 }
  0x2a   : > { %204 = vst [vmem:[#allocation2 + $0x10] sm:$0xff] (!%p381_p11), %v500_v8  ;;  %205 = vst [vmem:[#allocation2 + $0x18] sm:$0xff] (!%p381_p11), %v500_v8 }
  0x2b   : > { %206 = vst [vmem:[#allocation2 + $0x20] sm:$0xff] (!%p381_p11), %v500_v8  ;;  %207 = vst [vmem:[#allocation2 + $0x28] sm:$0xff] (!%p381_p11), %v500_v8 }
  0x2c   : > { %208 = vst [vmem:[#allocation2 + $0x30] sm:$0xff] (!%p381_p11), %v500_v8  ;;  %209 = vst [vmem:[#allocation2 + $0x38] sm:$0xff] (!%p381_p11), %v500_v8 }
  0x2e PF: > { %s382_s6 = sshll.u32 %s482_s8, 7  ;;  %v211_v9 = vlaneseq  ;;  %v213_v12 = vld [vmem:[%s580_s16] sm:$0xff]  ;;  %v214_v14 = vld [vmem:[%s580_s16 + $0x8] sm:$0xff]  ;;  %v215_v16 = vld [vmem:[%s580_s16 + $0x10] sm:$0xff]  ;;  %p383_p12 = scmp.ne.s32.totalorder %s482_s8, 1 }
  0x2f   : > { %v221_v10 = vstv %s382_s6  ;;  %v216_v19 = vld [vmem:[%s580_s16 + $0x18] sm:$0xff]  ;;  %v217_v21 = vld [vmem:[%s580_s16 + $0x20] sm:$0xff]  ;;  %v218_v23 = vld [vmem:[%s580_s16 + $0x28] sm:$0xff]  ;;  %vm284_vm1 = vcmask (!%p383_p12), 7168  }
  0x30   : > { %v212_v11 = vand.u32 127, %v211_v9  ;;  %v232_v13 = vld [vmem:[#allocation2] sm:$0xff]  ;;  %v233_v15 = vld [vmem:[#allocation2 + $0x8] sm:$0xff]  ;;  %v219_v25 = vld [vmem:[%s580_s16 + $0x30] sm:$0xff] }
  0x31   : > { %v234_v18 = vld [vmem:[#allocation2 + $0x10] sm:$0xff]  ;;  %v235_v20 = vld [vmem:[#allocation2 + $0x18] sm:$0xff] }
  0x32   : > { %v222_v17 = vadd.s32 %v221_v10, %v212_v11  ;;  %v236_v22 = vld [vmem:[#allocation2 + $0x20] sm:$0xff]  ;;  %v237_v24 = vld [vmem:[#allocation2 + $0x28] sm:$0xff]  ;;  %v220_v26 = vld [vmem:[%s580_s16 + $0x38] sm:$0xff] }
  0x33   : > { %v238_v31 = vld [vmem:[#allocation2 + $0x30] sm:$0xff]  ;;  %v239_v32 = vld [vmem:[#allocation2 + $0x38] sm:$0xff] }
  0x34   : > { %vm223_vm0 = vcmp.lt.s32.totalorder %v222_v17, 196 }
  0x35   : > { %v224_v27 = vsel %vm223_vm0, %v213_v12, 0.0  ;;  %v225_v28 = vsel %vm223_vm0, %v214_v14, 0.0  ;;  %v226_v29 = vsel %vm223_vm0, %v215_v16, 0.0  ;;  %v227_v30 = vsel %vm223_vm0, %v216_v19, 0.0  ;;  %259 = sbr.rel (%p383_p12) target bundleno = 220 (0xdc), region = 70 }
  0x36   : > { %v240_v33 = vadd.f32 %v232_v13, %v224_v27  ;;  %v241_v34 = vadd.f32 %v233_v15, %v225_v28  ;;  %v242_v35 = vadd.f32 %v234_v18, %v226_v29  ;;  %v243_v36 = vadd.f32 %v235_v20, %v227_v30 }
  0x37   : > { %v228_v37 = vsel %vm223_vm0, %v217_v21, 0.0  ;;  %v229_v38 = vsel %vm223_vm0, %v218_v23, 0.0  ;;  %v230_v39 = vsel %vm223_vm0, %v219_v25, 0.0  ;;  %v231_v40 = vsel %vm223_vm0, %v220_v26, 0.0 }
  0x38   : > { %248 = vst [vmem:[#allocation2] sm:$0xff] %v240_v33  ;;  %249 = vst [vmem:[#allocation2 + $0x8] sm:$0xff] %v241_v34  ;;  %v244_v41 = vadd.f32 %v236_v22, %v228_v37  ;;  %v245_v42 = vadd.f32 %v237_v24, %v229_v38  ;;  %v246_v43 = vadd.f32 %v238_v31, %v230_v39 }
  0x39   : > { %250 = vst [vmem:[#allocation2 + $0x10] sm:$0xff] %v242_v35  ;;  %251 = vst [vmem:[#allocation2 + $0x18] sm:$0xff] %v243_v36  ;;  %v247_v44 = vadd.f32 %v239_v32, %v231_v40 }
  0x3a   : > { %252 = vst [vmem:[#allocation2 + $0x20] sm:$0xff] %v244_v41  ;;  %253 = vst [vmem:[#allocation2 + $0x28] sm:$0xff] %v245_v42 }
  0x3b   : > { %254 = vst [vmem:[#allocation2 + $0x30] sm:$0xff] %v246_v43  ;;  %255 = vst [vmem:[#allocation2 + $0x38] sm:$0xff] %v247_v44 }
  0x3f   : > { %v260_v46 = vld [vmem:[#allocation2] sm:$0xff]  ;;  %v261_v48 = vld [vmem:[#allocation2 + $0x8] sm:$0xff] }
  0x40   : > { %v262_v45 = vld [vmem:[#allocation2 + $0x10] sm:$0xff]  ;;  %268 = vadd.xlane.f32.xlu0 %v260_v46  ;;  %v263_v47 = vld [vmem:[#allocation2 + $0x18] sm:$0xff] }
  0x41   : > { %272 = vadd.xlane.f32.xlu1 %v262_v45  ;;  %v265_v49 = vld [vmem:[#allocation2 + $0x28] sm:$0xff]  ;;  %v264_v50 = vld [vmem:[#allocation2 + $0x20] sm:$0xff] }
  0x42   : > { %v267_v51 = vld [vmem:[#allocation2 + $0x38] sm:$0xff]  ;;  %v266_v52 = vld [vmem:[#allocation2 + $0x30] sm:$0xff] }
  0x44   : > { %270 = vadd.xlane.f32.xlu0 %v261_v48 }
  0x45   : > { %274 = vadd.xlane.f32.xlu1 %v263_v47 }
  0x48   : > { %276 = vadd.xlane.f32.xlu0 %v264_v50 }
  0x49   : > { %278 = vadd.xlane.f32.xlu1 %v265_v49 }
  0x4c   : > { %280 = vadd.xlane.f32.xlu0 %v266_v52 }
  0x4d   : > { %282 = vadd.xlane.f32.xlu1 %v267_v51 }
  0xcd   : > { %v269_v54 = vpop.xlane.xlu0 %268 }
  0xce   : > { %v273_v53 = vpop.xlane.xlu1 %272  ;;  %285 = vst.msk [vmem:[%s578_s15] sm:$0xff] %vm284_vm1, %v269_v54 }
  0xcf   : > { %287 = vst.msk [vmem:[%s578_s15 + $0x10] sm:$0xff] %vm284_vm1, %v273_v53 }
  0xd1   : > { %v271_v56 = vpop.xlane.xlu0 %270 }
  0xd2   : > { %v275_v55 = vpop.xlane.xlu1 %274  ;;  %286 = vst.msk [vmem:[%s578_s15 + $0x8] sm:$0xff] %vm284_vm1, %v271_v56 }
  0xd3   : > { %288 = vst.msk [vmem:[%s578_s15 + $0x18] sm:$0xff] %vm284_vm1, %v275_v55 }
  0xd5   : > { %v277_v58 = vpop.xlane.xlu0 %276 }
  0xd6   : > { %v279_v57 = vpop.xlane.xlu1 %278  ;;  %289 = vst.msk [vmem:[%s578_s15 + $0x20] sm:$0xff] %vm284_vm1, %v277_v58 }
  0xd7   : > { %290 = vst.msk [vmem:[%s578_s15 + $0x28] sm:$0xff] %vm284_vm1, %v279_v57 }
  0xd9   : > { %v281_v60 = vpop.xlane.xlu0 %280 }
  0xda   : > { %v283_v59 = vpop.xlane.xlu1 %282  ;;  %291 = vst.msk [vmem:[%s578_s15 + $0x30] sm:$0xff] %vm284_vm1, %v281_v60 }
  0xdb   : > { %292 = vst.msk [vmem:[%s578_s15 + $0x38] sm:$0xff] %vm284_vm1, %v283_v59 }
  0xdc PF: > { %s11_s12 = sadd.s32 1, %s498_s12   ;;  %s640_s6 = smov %s478_s7 }
  0xdd   : > { %p8_p13 = scmp.ge.s32.totalorder %s11_s12, 6   ;;  %s641_s7 = smov %s562_s19 }
  0xde   : > { %s642_s8 = smov %s490_s10  ;;  %s643_s9 = smov %s494_s11 }
  0xdf   : > { %s644_s10 = smov %s647_s13  ;;  %s645_s11 = smov %s651_s14 }
  0xe0   :  { %10 = sbr.rel (!%p8_p13) target bundleno = 4 (0x4), region = 105 }

</bundles_post_ra>
